<compile_context>
chip_gen: v7x
topology: tpu7x:2x2x1
jax: 0.10.0
libtpu: 0.0.40
codegen_flags: <defaults>
</compile_context>

<pallas_src>
import math
import functools

import jax
import jax.numpy as jnp
from jax import lax
from jax.experimental import pallas as pl
from jax.experimental.pallas import tpu as pltpu

LANES = 128
MAX_TB = 512  # batch tile rows (f32/bf16; multiple of 8)


def _round_up(x, m):
    return ((x + m - 1) // m) * m


def make_grpo_kernel(state_dim_p, action_dim):
    """Build the fused kernel. Weight-slab row offsets are static."""
    r0 = 0
    r1 = r0 + state_dim_p      # end of W0 block
    r2 = r1 + LANES            # end of W1 block
    r3 = r2 + LANES            # end of fused head stage-1 block
    r4 = r3 + LANES            # end of fused head stage-2 (block-diag) block

    def kernel(x_ref, w_ref, b_ref, out_ref):
        mdt = w_ref.dtype                   # MXU operand dtype (f32 or bf16)
        x = x_ref[...]                      # (TB, state_dim_p)
        b = b_ref[...]                      # (4, 128) f32
        b0, b1, bh1, bh2 = b[0:1], b[1:2], b[2:3], b[3:4]

        # ---- feature trunk: Linear -> ReLU (x2), all 128-lane dense ----
        h = jnp.dot(x.astype(mdt), w_ref[r0:r1, :],
                    preferred_element_type=jnp.float32) + b0
        h = jnp.maximum(h, 0.0)
        f = jnp.dot(h.astype(mdt), w_ref[r1:r2, :],
                    preferred_element_type=jnp.float32) + b1
        f = jnp.maximum(f, 0.0)

        # ---- fused heads, stage 1: [wa1 | wc1 | wd1] -> single matmul + ReLU ----
        g = jnp.dot(f.astype(mdt), w_ref[r2:r3, :],
                    preferred_element_type=jnp.float32) + bh1
        g = jnp.maximum(g, 0.0)

        # ---- fused heads, stage 2: block-diag [wa2; wc2; wd2] -> single matmul ----
        raw = jnp.dot(g.astype(mdt), w_ref[r3:r4, :],
                      preferred_element_type=jnp.float32) + bh2

        # tanh only on the actor columns (cols [0, action_dim)); rest pass through.
        col = lax.broadcasted_iota(jnp.int32, raw.shape, 1)
        out_ref[...] = jnp.where(col < action_dim, jnp.tanh(raw), raw
                                 ).astype(out_ref.dtype)

    return kernel


def pack_params(p, state_dim, action_dim, hidden_dims, use_bf16=False):
    """Pack 16 per-layer params into one weight slab and one bias slab.

    Runs ONCE at init (hoisted out of the per-call path).
    NOTE: weights here are stored (in, out); PyTorch nn.Linear stores (out, in)
    and imported checkpoints must be transposed.
    """
    # Preconditions the fused kernel relies on.
    assert len(hidden_dims) == 3, "kernel hardcodes two trunk layers + head hidden"
    h0, h1, h_last = hidden_dims
    assert h0 <= LANES and h1 <= LANES, "trunk widths must be <= 128"
    assert 3 * h_last <= LANES, "3 * hidden_dims[-1] must be <= 128"
    assert action_dim + 2 <= LANES, "action_dim + 2 must be <= 128"

    sdp = _round_up(state_dim, 8)
    wdt = jnp.bfloat16 if use_bf16 else jnp.float32

    def pad_w(w, rows):
        out = jnp.zeros((rows, LANES), jnp.float32)
        return out.at[: w.shape[0], : w.shape[1]].set(w)

    def pad_b(b):
        out = jnp.zeros((1, LANES), jnp.float32)
        return out.at[:, : b.shape[1]].set(b)

    # trunk
    w0p = pad_w(p["w0"], sdp)                                      # (sdp, 128)
    w1p = pad_w(p["w1"], LANES)                                    # (128, 128)

    # fused head stage 1: concat along output axis
    wh1 = jnp.concatenate([p["wa1"], p["wc1"], p["wd1"]], axis=1)  # (h1, 3*h_last)
    wh1p = pad_w(wh1, LANES)                                       # (128, 128)
    bh1 = jnp.concatenate([p["ba1"], p["bc1"], p["bd1"]], axis=1)  # (1, 3*h_last)

    # fused head stage 2: block diagonal
    wh2 = jnp.zeros((3 * h_last, action_dim + 2), jnp.float32)
    wh2 = wh2.at[0:h_last, 0:action_dim].set(p["wa2"])
    wh2 = wh2.at[h_last:2 * h_last, action_dim:action_dim + 1].set(p["wc2"])
    wh2 = wh2.at[2 * h_last:3 * h_last, action_dim + 1:action_dim + 2].set(p["wd2"])
    wh2p = pad_w(wh2, LANES)                                       # (128, 128)
    bh2 = jnp.concatenate([p["ba2"], p["bc2"], p["bd2"]], axis=1)  # (1, action_dim+2)

    w_slab = jnp.concatenate([w0p, w1p, wh1p, wh2p], axis=0).astype(wdt)
    b_slab = jnp.concatenate(
        [pad_b(p["b0"]), pad_b(p["b1"]), pad_b(bh1), pad_b(bh2)], axis=0
    )                                                               # (4, 128) f32
    return w_slab, b_slab


def build_grpo_forward(state_dim, action_dim, hidden_dims, use_bf16=False):
    """Return a jitted forward(x, w_slab, b_slab) -> (actor, critic, adv)."""
    del hidden_dims  # widths are baked into the packed slabs
    sdp = _round_up(state_dim, 8)
    kernel = make_grpo_kernel(sdp, action_dim)
    wdt = jnp.bfloat16 if use_bf16 else jnp.float32
    out_dt = jnp.bfloat16 if use_bf16 else jnp.float32

    @jax.jit
    def forward(x, w_slab, b_slab):
        B = x.shape[0]

        # Pad the input feature dim to a sublane multiple (zeros; padded weight
        # rows are zero so this is numerically inert).  Deliberately NOT padded
        # to 128 lanes (would 4x the x DMA for no MXU benefit).
        if sdp != state_dim:
            x = jnp.pad(x, ((0, 0), (0, sdp - state_dim)))

        # Batch tile: multiple of 8 sublanes, up to MAX_TB rows.
        TB = MAX_TB if B >= MAX_TB else _round_up(B, 8)
        Bp = _round_up(B, TB)
        if Bp != B:
            x = jnp.pad(x, ((0, Bp - B), (0, 0)))
        x = x.astype(wdt)

        grid = (pl.cdiv(Bp, TB),)
        out = pl.pallas_call(
            kernel,
            out_shape=jax.ShapeDtypeStruct((Bp, LANES), out_dt),
            grid=grid,
            in_specs=[
                # x: tiled over the batch grid axis
                pl.BlockSpec((TB, sdp), lambda i: (i, 0)),
                # weight slab: constant index_map -> stays VMEM-resident
                pl.BlockSpec((sdp + 3 * LANES, LANES), lambda i: (0, 0)),
                # bias slab: constant index_map -> stays VMEM-resident
                pl.BlockSpec((4, LANES), lambda i: (0, 0)),
            ],
            out_specs=pl.BlockSpec((TB, LANES), lambda i: (i, 0)),
            compiler_params=pltpu.CompilerParams(
                dimension_semantics=("parallel",)),
        )(x, w_slab, b_slab)

        out = out[:B]
        actor = out[:, :action_dim].astype(jnp.float32)
        critic = out[:, action_dim:action_dim + 1].astype(jnp.float32)
        adv = out[:, action_dim + 1:action_dim + 2].astype(jnp.float32)
        return actor, critic, adv

    return forward


def init_params(key, state_dim, action_dim, hidden_dims):
    """Deterministic PyTorch-style (Kaiming-uniform) init, weights stored (in, out)."""
    def linear(k, fan_in, fan_out):
        kw, kb = jax.random.split(k)
        bound = 1.0 / math.sqrt(fan_in)
        w = jax.random.uniform(kw, (fan_in, fan_out), jnp.float32, -bound, bound)
        b = jax.random.uniform(kb, (1, fan_out), jnp.float32, -bound, bound)
        return w, b

    keys = jax.random.split(key, 8)
    h0, h1, h_last = hidden_dims[0], hidden_dims[1], hidden_dims[-1]

    p = {}
    p["w0"], p["b0"] = linear(keys[0], state_dim, h0)
    p["w1"], p["b1"] = linear(keys[1], h0, h1)
    # actor head
    p["wa1"], p["ba1"] = linear(keys[2], h1, h_last)
    p["wa2"], p["ba2"] = linear(keys[3], h_last, action_dim)
    # critic head
    p["wc1"], p["bc1"] = linear(keys[4], h1, h_last)
    p["wc2"], p["bc2"] = linear(keys[5], h_last, 1)
    # adversarial critic head
    p["wd1"], p["bd1"] = linear(keys[6], h1, h_last)
    p["wd2"], p["bd2"] = linear(keys[7], h_last, 1)
    return p


def reference_forward(x, p):
    """Pure-JAX reference for correctness check (unfused)."""
    h = jnp.maximum(x @ p["w0"] + p["b0"], 0.0)
    f = jnp.maximum(h @ p["w1"] + p["b1"], 0.0)
    a = jnp.maximum(f @ p["wa1"] + p["ba1"], 0.0)
    actor = jnp.tanh(a @ p["wa2"] + p["ba2"])
    c = jnp.maximum(f @ p["wc1"] + p["bc1"], 0.0)
    critic = c @ p["wc2"] + p["bc2"]
    d = jnp.maximum(f @ p["wd1"] + p["bd1"], 0.0)
    adv = d @ p["wd2"] + p["bd2"]
    return actor, critic, adv


if __name__ == "__main__":
    # Small shapes consistent with the module's forward:
    # state_dim=32, hidden_dims=[64, 64, 32], action_dim=4, batch=8.
    state_dim, action_dim = 32, 4
    hidden_dims = [64, 64, 32]
    B = 8

    key = jax.random.PRNGKey(0)
    kx, kp = jax.random.split(key)
    x = jax.random.normal(kx, (B, state_dim), dtype=jnp.float32)
    params = init_params(kp, state_dim, action_dim, hidden_dims)

    # Pure-JAX reference.
    ra, rc, rd = reference_forward(x, params)

    # ---- f32 mode: exact parity with the reference ----
    w32, b32 = pack_params(params, state_dim, action_dim, hidden_dims, use_bf16=False)
    fwd_f32 = build_grpo_forward(state_dim, action_dim, hidden_dims, use_bf16=False)
    actor, critic, adv = fwd_f32(x, w32, b32)
    jax.block_until_ready((actor, critic, adv))

    assert actor.shape == (B, action_dim)
    assert critic.shape == (B, 1)
    assert adv.shape == (B, 1)
    assert jnp.allclose(actor, ra, atol=1e-5, rtol=1e-5)
    assert jnp.allclose(critic, rc, atol=1e-5, rtol=1e-5)
    assert jnp.allclose(adv, rd, atol=1e-5, rtol=1e-5)

    # ---- bf16 MXU-operand mode (perf path for v5e/v6e/v7x): loose tolerance ----
    wbf, bbf = pack_params(params, state_dim, action_dim, hidden_dims, use_bf16=True)
    fwd_bf16 = build_grpo_forward(state_dim, action_dim, hidden_dims, use_bf16=True)
    a2, c2, d2 = fwd_bf16(x, wbf, bbf)
    jax.block_until_ready((a2, c2, d2))
    assert jnp.allclose(a2, ra, atol=5e-2, rtol=5e-2)
    assert jnp.allclose(c2, rc, atol=5e-2, rtol=5e-2)
    assert jnp.allclose(d2, rd, atol=5e-2, rtol=5e-2)

    print("KERNEL_OK")
</pallas_src>

<mosaic_0001>
module attributes {stable_mosaic.version = 11 : i64} {
  func.func @kernel(%arg0: i32, %arg1: memref<8x32xf32, #tpu.memory_space<vmem>>, %arg2: memref<416x128xf32, #tpu.memory_space<vmem>>, %arg3: memref<4x128xf32, #tpu.memory_space<vmem>>, %arg4: memref<8x128xf32, #tpu.memory_space<vmem>>) attributes {dimension_semantics = [#tpu.dimension_semantics<parallel>], iteration_bounds = array<i64: 1>, scalar_prefetch = 0 : i64, scratch_operands = 0 : i64, tpu.core_type = #tpu.core_type<tc>, window_params = [{transform_indices = @transform_0, window_bounds = array<i64: 8, 32>}, {pipeline_mode = #tpu.pipeline_mode<synchronous>, transform_indices = @transform_1, window_bounds = array<i64: 416, 128>}, {pipeline_mode = #tpu.pipeline_mode<synchronous>, transform_indices = @transform_2, window_bounds = array<i64: 4, 128>}, {transform_indices = @transform_3, window_bounds = array<i64: 8, 128>}]} {
    %c0 = arith.constant 0 : index
    %c0_0 = arith.constant 0 : index
    %0 = vector.load %arg1[%c0, %c0_0] : memref<8x32xf32, #tpu.memory_space<vmem>>, vector<8x32xf32>
    %c0_1 = arith.constant 0 : index
    %c0_2 = arith.constant 0 : index
    %1 = vector.load %arg3[%c0_1, %c0_2] : memref<4x128xf32, #tpu.memory_space<vmem>>, vector<4x128xf32>
    %2 = vector.extract_strided_slice %1 {offsets = [0, 0], sizes = [1, 128], strides = [1, 1]} : vector<4x128xf32> to vector<1x128xf32>
    %3 = vector.extract_strided_slice %1 {offsets = [1, 0], sizes = [1, 128], strides = [1, 1]} : vector<4x128xf32> to vector<1x128xf32>
    %4 = vector.extract_strided_slice %1 {offsets = [2, 0], sizes = [1, 128], strides = [1, 1]} : vector<4x128xf32> to vector<1x128xf32>
    %5 = vector.extract_strided_slice %1 {offsets = [3, 0], sizes = [1, 128], strides = [1, 1]} : vector<4x128xf32> to vector<1x128xf32>
    %c0_3 = arith.constant 0 : index
    %c0_4 = arith.constant 0 : index
    %6 = vector.load %arg2[%c0_3, %c0_4] : memref<416x128xf32, #tpu.memory_space<vmem>>, vector<32x128xf32>
    %cst = arith.constant dense<0.000000e+00> : vector<8x128xf32>
    %7 = tpu.matmul %0, %6, %cst {dimension_numbers = #tpu.dot_dimension_numbers<[1], [0], [0], [1], [0, 0, 1, 1], [], []>} : vector<8x32xf32>, vector<32x128xf32>, vector<8x128xf32> -> vector<8x128xf32>
    %8 = vector.broadcast %2 : vector<1x128xf32> to vector<8x128xf32>
    %9 = arith.addf %7, %8 : vector<8x128xf32>
    %cst_5 = arith.constant 0.000000e+00 : f32
    %10 = vector.broadcast %cst_5 : f32 to vector<8x128xf32>
    %11 = arith.maximumf %9, %10 : vector<8x128xf32>
    %c32 = arith.constant 32 : index
    %c0_6 = arith.constant 0 : index
    %12 = vector.load %arg2[%c32, %c0_6] : memref<416x128xf32, #tpu.memory_space<vmem>>, vector<128x128xf32>
    %cst_7 = arith.constant dense<0.000000e+00> : vector<8x128xf32>
    %13 = tpu.matmul %11, %12, %cst_7 {dimension_numbers = #tpu.dot_dimension_numbers<[1], [0], [0], [1], [0, 0, 1, 1], [], []>} : vector<8x128xf32>, vector<128x128xf32>, vector<8x128xf32> -> vector<8x128xf32>
    %14 = vector.broadcast %3 : vector<1x128xf32> to vector<8x128xf32>
    %15 = arith.addf %13, %14 : vector<8x128xf32>
    %cst_8 = arith.constant 0.000000e+00 : f32
    %16 = vector.broadcast %cst_8 : f32 to vector<8x128xf32>
    %17 = arith.maximumf %15, %16 : vector<8x128xf32>
    %c160 = arith.constant 160 : index
    %c0_9 = arith.constant 0 : index
    %18 = vector.load %arg2[%c160, %c0_9] : memref<416x128xf32, #tpu.memory_space<vmem>>, vector<128x128xf32>
    %cst_10 = arith.constant dense<0.000000e+00> : vector<8x128xf32>
    %19 = tpu.matmul %17, %18, %cst_10 {dimension_numbers = #tpu.dot_dimension_numbers<[1], [0], [0], [1], [0, 0, 1, 1], [], []>} : vector<8x128xf32>, vector<128x128xf32>, vector<8x128xf32> -> vector<8x128xf32>
    %20 = vector.broadcast %4 : vector<1x128xf32> to vector<8x128xf32>
    %21 = arith.addf %19, %20 : vector<8x128xf32>
    %cst_11 = arith.constant 0.000000e+00 : f32
    %22 = vector.broadcast %cst_11 : f32 to vector<8x128xf32>
    %23 = arith.maximumf %21, %22 : vector<8x128xf32>
    %c288 = arith.constant 288 : index
    %c0_12 = arith.constant 0 : index
    %24 = vector.load %arg2[%c288, %c0_12] : memref<416x128xf32, #tpu.memory_space<vmem>>, vector<128x128xf32>
    %cst_13 = arith.constant dense<0.000000e+00> : vector<8x128xf32>
    %25 = tpu.matmul %23, %24, %cst_13 {dimension_numbers = #tpu.dot_dimension_numbers<[1], [0], [0], [1], [0, 0, 1, 1], [], []>} : vector<8x128xf32>, vector<128x128xf32>, vector<8x128xf32> -> vector<8x128xf32>
    %26 = vector.broadcast %5 : vector<1x128xf32> to vector<8x128xf32>
    %27 = arith.addf %25, %26 : vector<8x128xf32>
    %28 = tpu.iota {dimensions = array<i32: 1>} : vector<8x128xi32>
    %c4_i32 = arith.constant 4 : i32
    %29 = vector.broadcast %c4_i32 : i32 to vector<8x128xi32>
    %30 = arith.cmpi slt, %28, %29 : vector<8x128xi32>
    %31 = math.tanh %27 : vector<8x128xf32>
    %32 = arith.select %30, %31, %27 : vector<8x128xi1>, vector<8x128xf32>
    %c0_14 = arith.constant 0 : index
    %c0_15 = arith.constant 0 : index
    %33 = vector.load %arg4[%c0_14, %c0_15] : memref<8x128xf32, #tpu.memory_space<vmem>>, vector<8x128xf32>
    tpu.vector_store %arg4[%c0_14, %c0_15], %32 {strides = array<i32>} : memref<8x128xf32, #tpu.memory_space<vmem>>, vector<8x128xf32>,
    return
  }
  func.func @transform_0(%arg0: i32) -> (i32, i32) {
    %c0_i32 = arith.constant 0 : i32
    %c0_i32_0 = arith.constant 0 : i32
    return %arg0, %c0_i32 : i32, i32
  }
  func.func @transform_1(%arg0: i32) -> (i32, i32) {
    %c0_i32 = arith.constant 0 : i32
    %c0_i32_0 = arith.constant 0 : i32
    %c0_i32_1 = arith.constant 0 : i32
    return %c0_i32, %c0_i32_0 : i32, i32
  }
  func.func @transform_2(%arg0: i32) -> (i32, i32) {
    %c0_i32 = arith.constant 0 : i32
    %c0_i32_0 = arith.constant 0 : i32
    %c0_i32_1 = arith.constant 0 : i32
    return %c0_i32, %c0_i32_0 : i32, i32
  }
  func.func @transform_3(%arg0: i32) -> (i32, i32) {
    %c0_i32 = arith.constant 0 : i32
    %c0_i32_0 = arith.constant 0 : i32
    return %arg0, %c0_i32 : i32, i32
  }
}

</mosaic_0001>

<bundles_post_ra>
// kernel: forward.1
= control target key start
LH: loop header
LB: loop body
LE: loop exit
PB: predicated region body
PF: predicated region fallthrough
CT: control target
= control target key end

     0   :  { %8 = vsyncpa [#allocation3], 0  ;;  %s829_s0 = inlined_call_operand.hbm [shape: f32[8,32], index: 0, kind: input, shape index: {}]   ;;  %s830_s1 = inlined_call_operand.hbm [shape: f32[416,128], index: 1, kind: input, shape index: {}]   ;;  %s831_s2 = inlined_call_operand.vmem [shape: f32[4,128], index: 2, kind: input, shape index: {}]   ;;  %s832_s3 = inlined_call_operand.vmem [shape: f32[8,128], index: 3, kind: output, shape index: {}]  }
   0x1   :  { %9 = vsyncpa [#allocation5], 0  ;;  %s717_s12 = smov [#allocation2]   ;;  %s718_s14 = smov [#allocation4]  }
   0x2   :  { %s16_s13 = sshll.u32 %s717_s12, 4  ;;  %s25_s15 = sshll.u32 %s718_s14, 4  ;;  %s17_s13 = int_to_ptr.vmem [resolvable:$true] %s16_s13  ;;  %s744_s15 = int_to_ptr.vmem [resolvable:$true] %s25_s15 }
   0x3   :  { %s669_s18 = scalar_lea.hbm %s829_s0, 128 }
   0x4   :  { %p670_p0 = scmp.ne.s32.totalorder %s829_s0, %s669_s18  ;;  %p673_p1 = scmp.lt.u32.totalorder %s669_s18, %s829_s0 }
   0x6   :  { %p675_p2 = pnand %p673_p1, %p670_p0 }
   0x8   :  { %678 = shalt.err (!%p675_p2)
}
   0x9   :  { %s679_s23 = scalar_lea.vmem %s17_s13, 128  ;;  %p684_p4 = scmp.lt.s32.totalorder %s17_s13, %s17_s13 }
   0xa   :  { %p680_p3 = scmp.ne.s32.totalorder %s17_s13, %s679_s23  ;;  %p685_p5 = scmp.lt.s32.totalorder %s679_s23, %s679_s23 }
   0xc   :  { %p686_p6 = por %p685_p5, %p684_p4 }
   0xe   :  { %p687_p7 = pnand %p686_p6, %p680_p3 }
  0x10   :  { %690 = shalt.err (!%p687_p7)
}
  0x11   :  { %19 = dma.hbm_to_vmem [thread:$0]  %s829_s0, 128, %s17_s13, [#allocation3]  }
  0x12   :  { %s691_s28 = scalar_lea.hbm %s830_s1, 6656 }
  0x13   :  { %p692_p8 = scmp.ne.s32.totalorder %s830_s1, %s691_s28  ;;  %p695_p9 = scmp.lt.u32.totalorder %s691_s28, %s830_s1 }
  0x15   :  { %p697_p10 = pnand %p695_p9, %p692_p8 }
  0x17   :  { %700 = shalt.err (!%p697_p10)
}
  0x18   :  { %s701_s6 = scalar_lea.vmem %s744_s15, 6656  ;;  %p706_p12 = scmp.lt.s32.totalorder %s744_s15, %s744_s15 }
  0x19   :  { %p702_p11 = scmp.ne.s32.totalorder %s744_s15, %s701_s6  ;;  %p707_p13 = scmp.lt.s32.totalorder %s701_s6, %s701_s6 }
  0x1b   :  { %p708_p0 = por %p707_p13, %p706_p12 }
  0x1d   :  { %p709_p1 = pnand %p708_p0, %p702_p11 }
  0x1f   :  { %712 = shalt.err (!%p709_p1)
}
  0x20   :  { %s719_s0 = smov 128   ;;  %s720_s7 = smov 8  }
  0x21   :  { %31 = dma.hbm_to_vmem [thread:$0]  %s830_s1, 6656, %s744_s15, [#allocation5], %s719_s0, %s719_s0, %s720_s7  }
  0x22   :  { %713 = dma.done.wait [#allocation3], 128  }
  0x23   :  { %714 = vsyncadd [#allocation3], 4294967168 }
  0x24   :  { %715 = dma.done.wait [#allocation5], 6656  }
  0x25   :  { %716 = vsyncadd [#allocation5], 4294960640  ;;  %v721_v0 = vmov 0.0|0.0   ;;  %vm722_vm0 = vmmov 0   ;;  %v723_v1 = vmov 0.0   ;;  %v42_v2 = vld [vmem:[#allocation4] sm:$0xff]  ;;  %v46_v54 = vlaneseq }
  0x26   :  { %582 = vmatprep.subr.bf16.mxu0 %v721_v0  ;;  %474 = vmatprep.mubr.msk.f32.mxu0 %vm722_vm0, %v723_v1  ;;  %v43_v3 = vld [vmem:[#allocation4 + $0x8] sm:$0xff]  ;;  %v44_v4 = vld [vmem:[#allocation4 + $0x10] sm:$0xff]  ;;  %v45_v6 = vld [vmem:[#allocation4 + $0x18] sm:$0xff]  ;;  %vm50_vm1 = vcmask 261120  }
  0x27   :  { %588 = vmatprep.subr.bf16.mxu1 %v721_v0  ;;  %509 = vmatprep.mubr.msk.f32.mxu1 %vm722_vm0, %v723_v1  ;;  %v583_v5 = vpack.c.bf16 %v43_v3, %v42_v2  ;;  %v125_v7 = vld [vmem:[#allocation4 + $0x20] sm:$0xff]  ;;  %v126_v8 = vld [vmem:[#allocation4 + $0x28] sm:$0xff]  ;;  %v127_v9 = vld [vmem:[#allocation4 + $0x30] sm:$0xff]  ;;  %v586_v11 = vpack.c.bf16 %v45_v6, %v44_v4  ;;  %v801_v55 = vshrl.u32 %v46_v54, 7 }
  0x28   :  { %v128_v10 = vld [vmem:[#allocation4 + $0x38] sm:$0xff]  ;;  %v589_v12 = vpack.c.bf16 %v126_v8, %v125_v7  ;;  %v129_v14 = vld [vmem:[#allocation4 + $0x40] sm:$0xff]  ;;  %v130_v15 = vld [vmem:[#allocation4 + $0x48] sm:$0xff] }
  0x29   :  { %584 = vmatpush3.bf16.msra.mxu0 %v583_v5  ;;  %v592_v13 = vpack.c.bf16 %v128_v10, %v127_v9  ;;  %v40_v16 = vld [vmem:[#allocation2] sm:$0xff]  ;;  %v595_v17 = vpack.c.bf16 %v130_v15, %v129_v14  ;;  %v131_v18 = vld [vmem:[#allocation4 + $0x50] sm:$0xff]  ;;  %v133_v21 = vld [vmem:[#allocation4 + $0x60] sm:$0xff]  ;;  %v48_v56 = vsub.s32 0, %v801_v55 }
  0x2a   :  { %585 = vmatprep.subr.bf16.mxu0 %v721_v0  ;;  %590 = vmatpush3.bf16.msra.mxu1 %v589_v12  ;;  %v132_v19 = vld [vmem:[#allocation4 + $0x58] sm:$0xff]  ;;  %v134_v22 = vld [vmem:[#allocation4 + $0x68] sm:$0xff]  ;;  %v135_v24 = vld [vmem:[#allocation4 + $0x70] sm:$0xff] }
  0x2b   :  { %591 = vmatprep.subr.bf16.mxu1 %v721_v0  ;;  %v598_v20 = vpack.c.bf16 %v132_v19, %v131_v18  ;;  %v601_v23 = vpack.c.bf16 %v134_v22, %v133_v21  ;;  %v136_v25 = vld [vmem:[#allocation4 + $0x78] sm:$0xff]  ;;  %v137_v27 = vld [vmem:[#allocation4 + $0x80] sm:$0xff]  ;;  %v138_v28 = vld [vmem:[#allocation4 + $0x88] sm:$0xff] }
  0x2c   :  { %v604_v26 = vpack.c.bf16 %v136_v25, %v135_v24  ;;  %v607_v29 = vpack.c.bf16 %v138_v28, %v137_v27  ;;  %v139_v30 = vld [vmem:[#allocation4 + $0x90] sm:$0xff]  ;;  %v140_v31 = vld [vmem:[#allocation4 + $0x98] sm:$0xff]  ;;  %v216_v33 = vld [vmem:[#allocation4 + $0xa0] sm:$0xff]  ;;  %v143_v24 = vsub.s32 1, %v801_v55 }
  0x2d   :  { %587 = vmatpush3.bf16.msra.mxu0 %v586_v11  ;;  %v610_v32 = vpack.c.bf16 %v140_v31, %v139_v30  ;;  %v217_v34 = vld [vmem:[#allocation4 + $0xa8] sm:$0xff]  ;;  %v218_v35 = vld [vmem:[#allocation4 + $0xb0] sm:$0xff]  ;;  %v219_v37 = vld [vmem:[#allocation4 + $0xb8] sm:$0xff] }
  0x2e   :  { %612 = vmatprep.subr.bf16.mxu0 %v721_v0  ;;  %593 = vmatpush3.bf16.msra.mxu1 %v592_v13  ;;  %v613_v36 = vpack.c.bf16 %v217_v34, %v216_v33  ;;  %v616_v38 = vpack.c.bf16 %v219_v37, %v218_v35  ;;  %v220_v39 = vld [vmem:[#allocation4 + $0xc0] sm:$0xff]  ;;  %v221_v40 = vld [vmem:[#allocation4 + $0xc8] sm:$0xff]  ;;  %v222_v42 = vld [vmem:[#allocation4 + $0xd0] sm:$0xff]  ;;  %v234_v33 = vsub.s32 2, %v801_v55 }
  0x2f   :  { %594 = vmatprep.subr.bf16.mxu1 %v721_v0  ;;  %v619_v41 = vpack.c.bf16 %v221_v40, %v220_v39  ;;  %v223_v43 = vld [vmem:[#allocation4 + $0xd8] sm:$0xff]  ;;  %v224_v45 = vld [vmem:[#allocation4 + $0xe0] sm:$0xff]  ;;  %v225_v46 = vld [vmem:[#allocation4 + $0xe8] sm:$0xff] }
  0x30   :  { %475 = vmatmul.mubr.msk.f32.vlgmr.msra.gmra.mrb[0].mxu0 %vm50_vm1, %v40_v16  ;;  %v622_v44 = vpack.c.bf16 %v223_v43, %v222_v42  ;;  %v625_v47 = vpack.c.bf16 %v225_v46, %v224_v45  ;;  %v226_v48 = vld [vmem:[#allocation4 + $0xf0] sm:$0xff]  ;;  %v227_v49 = vld [vmem:[#allocation4 + $0xf8] sm:$0xff]  ;;  %v228_v51 = vld [vmem:[#allocation4 + $0x100] sm:$0xff]  ;;  %v398_v43 = vand.u32 127, %v46_v54 }
  0x31   :  { %544 = vmatprep.mubr.msk.f32.mxu0 %vm722_vm0, %v723_v1  ;;  %614 = vmatpush3.bf16.msra.mxu0 %v613_v36  ;;  %v628_v50 = vpack.c.bf16 %v227_v49, %v226_v48  ;;  %v229_v52 = vld [vmem:[#allocation4 + $0x108] sm:$0xff]  ;;  %v807_v57 = vld [vmem:[%s831_s2] sm:$0xf]  ;;  %v231_v2 = vld [vmem:[#allocation4 + $0x118] sm:$0xff] }
  0x32   :  { %596 = vmatpush3.bf16.msra.mxu1 %v595_v17  ;;  %615 = vmatprep.subr.bf16.mxu0 %v721_v0  ;;  %v631_v53 = vpack.c.bf16 %v229_v52, %v228_v51  ;;  %v49_v58 = vrot.slane %v807_v57, %v48_v56  ;;  %v230_v63 = vld [vmem:[#allocation4 + $0x110] sm:$0xff]  ;;  %v307_v4 = vld [vmem:[#allocation4 + $0x120] sm:$0xff]  ;;  %v308_v5 = vld [vmem:[#allocation4 + $0x128] sm:$0xff]  ;;  %v144_v25 = vrot.slane %v807_v57, %v143_v24  ;;  %vm399_vm2 = vcmp.lt.s32.totalorder %v398_v43, 4 }
  0x33   :  { %597 = vmatprep.subr.bf16.mxu1 %v721_v0  ;;  %v634_v3 = vpack.c.bf16 %v231_v2, %v230_v63  ;;  %v309_v6 = vld [vmem:[#allocation4 + $0x130] sm:$0xff]  ;;  %v637_v7 = vpack.c.bf16 %v308_v5, %v307_v4  ;;  %v310_v8 = vld [vmem:[#allocation4 + $0x138] sm:$0xff]  ;;  %v311_v10 = vld [vmem:[#allocation4 + $0x140] sm:$0xff]  ;;  %v235_v34 = vrot.slane %v807_v57, %v234_v33 }
  0x34   :  { %v640_v9 = vpack.c.bf16 %v310_v8, %v309_v6  ;;  %v312_v11 = vld [vmem:[#allocation4 + $0x148] sm:$0xff]  ;;  %v314_v13 = vld [vmem:[#allocation4 + $0x158] sm:$0xff]  ;;  %v315_v15 = vld [vmem:[#allocation4 + $0x160] sm:$0xff] }
  0x35   :  { %617 = vmatpush3.bf16.msra.mxu0 %v616_v38  ;;  %v643_v12 = vpack.c.bf16 %v312_v11, %v311_v10  ;;  %v316_v16 = vld [vmem:[#allocation4 + $0x168] sm:$0xff]  ;;  %v317_v18 = vld [vmem:[#allocation4 + $0x170] sm:$0xff]  ;;  %v318_v19 = vld [vmem:[#allocation4 + $0x178] sm:$0xff]  ;;  %v325_v38 = vsub.s32 3, %v801_v55 }
  0x36   :  { %599 = vmatpush3.bf16.msra.mxu1 %v598_v20  ;;  %618 = vmatprep.subr.bf16.mxu0 %v721_v0  ;;  %v649_v17 = vpack.c.bf16 %v316_v16, %v315_v15  ;;  %v652_v20 = vpack.c.bf16 %v318_v19, %v317_v18  ;;  %v319_v21 = vld [vmem:[#allocation4 + $0x180] sm:$0xff]  ;;  %v320_v22 = vld [vmem:[#allocation4 + $0x188] sm:$0xff]  ;;  %v321_v30 = vld [vmem:[#allocation4 + $0x190] sm:$0xff] }
  0x37   :  { %600 = vmatprep.subr.bf16.mxu1 %v721_v0  ;;  %v322_v31 = vld [vmem:[#allocation4 + $0x198] sm:$0xff]  ;;  %v326_v39 = vrot.slane %v807_v57, %v325_v38 }
  0x39   :  { %620 = vmatpush3.bf16.msra.mxu0 %v619_v41 }
  0x3a   :  { %602 = vmatpush3.bf16.msra.mxu1 %v601_v23  ;;  %621 = vmatprep.subr.bf16.mxu0 %v721_v0  ;;  %v655_v23 = vpack.c.bf16 %v320_v22, %v319_v21 }
  0x3b   :  { %603 = vmatprep.subr.bf16.mxu1 %v721_v0 }
  0x3d   :  { %623 = vmatpush3.bf16.msra.mxu0 %v622_v44 }
  0x3e   :  { %605 = vmatpush3.bf16.msra.mxu1 %v604_v26  ;;  %624 = vmatprep.subr.bf16.mxu0 %v721_v0 }
  0x3f   :  { %606 = vmatprep.subr.bf16.mxu1 %v721_v0 }
  0x41   :  { %626 = vmatpush3.bf16.msra.mxu0 %v625_v47 }
  0x42   :  { %608 = vmatpush3.bf16.msra.mxu1 %v607_v29  ;;  %627 = vmatprep.subr.bf16.mxu0 %v721_v0 }
  0x43   :  { %609 = vmatprep.subr.bf16.mxu1 %v721_v0 }
  0x45   :  { %629 = vmatpush3.bf16.msra.mxu0 %v628_v50 }
  0x46   :  { %611 = vmatpush3.bf16.msra.mxu1 %v610_v32  ;;  %630 = vmatprep.subr.bf16.mxu0 %v721_v0  ;;  %v658_v32 = vpack.c.bf16 %v322_v31, %v321_v30 }
  0x47   :  { %636 = vmatprep.subr.bf16.mxu1 %v721_v0 }
  0x49   :  { %632 = vmatpush3.bf16.msra.mxu0 %v631_v53 }
  0x4a   :  { %633 = vmatprep.subr.bf16.mxu0 %v721_v0 }
  0x4d   :  { %635 = vmatpush3.bf16.msra.mxu0 %v634_v3 }
 0x103   :  { %v120_v59 = vpop.f32.mrb[0].mxu0 }
 0x104   :  { %v121_v60 = vadd.f32 %v120_v59, %v49_v58  ;;  %v476_v61 = vpop.f32.mrb[1].mxu0 }
 0x106   :  { %v124_v62 = vmax.f32 %v121_v60, 0.0 }
 0x108   :  { %510 = vmatmul.mubr.f32.vlgmr.msra.gmra.mrb[0].mxu1 %v124_v62 }
 0x109   :  { %579 = vmatprep.mubr.msk.f32.mxu1 %vm722_vm0, %v723_v1  ;;  %638 = vmatpush3.bf16.msra.mxu1 %v637_v7  ;;  %v313_v1 = vld [vmem:[#allocation4 + $0x150] sm:$0xff] }
 0x10a   :  { %639 = vmatprep.subr.bf16.mxu1 %v721_v0  ;;  %v646_v14 = vpack.c.bf16 %v314_v13, %v313_v1 }
 0x10d   :  { %641 = vmatpush3.bf16.msra.mxu1 %v640_v9 }
 0x10e   :  { %642 = vmatprep.subr.bf16.mxu1 %v721_v0 }
 0x111   :  { %644 = vmatpush3.bf16.msra.mxu1 %v643_v12 }
 0x112   :  { %645 = vmatprep.subr.bf16.mxu1 %v721_v0 }
 0x115   :  { %647 = vmatpush3.bf16.msra.mxu1 %v646_v14 }
 0x116   :  { %648 = vmatprep.subr.bf16.mxu1 %v721_v0 }
 0x119   :  { %650 = vmatpush3.bf16.msra.mxu1 %v649_v17 }
 0x11a   :  { %651 = vmatprep.subr.bf16.mxu1 %v721_v0 }
 0x11d   :  { %653 = vmatpush3.bf16.msra.mxu1 %v652_v20 }
 0x11e   :  { %654 = vmatprep.subr.bf16.mxu1 %v721_v0 }
 0x121   :  { %656 = vmatpush3.bf16.msra.mxu1 %v655_v23 }
 0x122   :  { %657 = vmatprep.subr.bf16.mxu1 %v721_v0 }
 0x125   :  { %659 = vmatpush3.bf16.msra.mxu1 %v658_v32 }
 0x1db   :  { %v211_v26 = vpop.f32.mrb[0].mxu1 }
 0x1dc   :  { %v212_v27 = vadd.f32 %v211_v26, %v144_v25  ;;  %v511_v28 = vpop.f32.mrb[1].mxu1 }
 0x1de   :  { %v215_v29 = vmax.f32 %v212_v27, 0.0 }
 0x1e0   :  { %545 = vmatmul.mubr.f32.vlgmr.msra.gmra.mrb[2].mxu0 %v215_v29 }
 0x2b3   :  { %v302_v35 = vpop.f32.mrb[2].mxu0 }
 0x2b4   :  { %v303_v36 = vadd.f32 %v302_v35, %v235_v34  ;;  %v546_v0 = vpop.f32.mrb[3].mxu0 }
 0x2b6   :  { %v306_v37 = vmax.f32 %v303_v36, 0.0 }
 0x2b8   :  { %580 = vmatmul.mubr.f32.vlgmr.msra.gmra.mrb[2].mxu1 %v306_v37 }
 0x38b   :  { %v393_v40 = vpop.f32.mrb[2].mxu1 }
 0x38c   :  { %v394_v41 = vadd.f32 %v393_v40, %v326_v39  ;;  %v581_v42 = vpop.f32.mrb[3].mxu1 }
 0x38e   :  { %667 = vtanh.f32 %v394_v41 }
 0x398   :  { %v668_v44 = vpop.eup %667 }
 0x399   :  { %v401_v45 = vsel %vm399_vm2, %v668_v44, %v394_v41 }
 0x39a   :  { %402 = vst [vmem:[%s832_s3] sm:$0xff] %v401_v45 }
 0x39b   :  { %407 = vsyncpa [#allocation3], 1 }
 0x39c   :  { %408 = vsyncpa [#allocation5], 1 }

</bundles_post_ra>
